<compile_context>
chip_gen: v6e
topology: v6e:2x2x1
jax: 0.10.0
libtpu: 0.0.40
codegen_flags: <defaults>
</compile_context>

<pallas_src>
import jax
import jax.numpy as jnp
from jax import lax
from jax.experimental import pallas as pl
from jax.experimental.pallas import tpu as pltpu


def _rbm_kernel(vc_ref,    # [TB, V+C]  bf16   ([v | context] batch tile)
                u_ref,     # [TB, H]    f32    uniform draws for this tile
                wc_ref,    # [H,  V+C]  bf16   fused weight [W | context_W]
                hb_ref,    # [1,  H]    f32
                vb_ref,    # [1,  V]    f32
                out_ref):  # [TB, V]    f32
    n_visible = out_ref.shape[1]

    # ---- hidden activations: one fused MXU matmul, contract over V+C ------
    h_act = lax.dot_general(
        vc_ref[...], wc_ref[...],
        dimension_numbers=(((1,), (1,)), ((), ())),   # vc @ Wc.T
        preferred_element_type=jnp.float32,
    ) + hb_ref[...]                                   # broadcast (1, H)
    h_prob = jax.nn.sigmoid(h_act)

    # ---- Bernoulli sampling:  h_sample = (U < p),  exact as 0/1 in bf16 ---
    h_sample = (u_ref[...] < h_prob).astype(jnp.bfloat16)

    # ---- reconstruct visible probabilities:  h_sample @ W -----------------
    w_part = wc_ref[:, :n_visible]                    # lane-aligned slice = W
    v_act = jnp.dot(h_sample, w_part,
                    preferred_element_type=jnp.float32) + vb_ref[...]
    out_ref[...] = jax.nn.sigmoid(v_act)


def context_aware_rbm_forward(v, context, W, context_W, h_bias, v_bias,
                              *, key=None, seed=0, block_b=256):
    """Pallas implementation of ContextAwareRBM.forward.

    `key`/`seed` supply the randomness for the Bernoulli sample (torch uses a
    stateful global RNG; here the caller threads the key explicitly).
    """
    B, n_visible = v.shape
    n_hidden = W.shape[0]
    n_context = context.shape[1]
    vc_dim = n_visible + n_context

    if key is None:
        key = jax.random.PRNGKey(seed)
    u = jax.random.uniform(key, (B, n_hidden), dtype=jnp.float32)

    # Fused operands: weight shipped once, bf16 for the MXU.
    wc = jnp.concatenate([W, context_W], axis=1).astype(jnp.bfloat16)
    vc = jnp.concatenate([v, context], axis=1).astype(jnp.bfloat16)
    hb = h_bias.reshape(1, n_hidden).astype(jnp.float32)
    vb = v_bias.reshape(1, n_visible).astype(jnp.float32)

    # Batch tile: 256 matches v6e/v7x MXU width; clamp for small batches.
    tb = min(block_b, B)
    grid = (pl.cdiv(B, tb),)

    # --- cost / VMEM budgeting ---------------------------------------------
    flops = 2 * B * vc_dim * n_hidden + 2 * B * n_hidden * n_visible
    transcendentals = B * n_hidden + B * n_visible          # sigmoids
    bytes_accessed = (vc.size * 2 + u.size * 4 + wc.size * 2
                      + hb.size * 4 + vb.size * 4 + B * n_visible * 4)
    cost = pl.CostEstimate(flops=flops,
                           transcendentals=transcendentals,
                           bytes_accessed=bytes_accessed)

    tile_bytes = tb * vc_dim * 2 + tb * n_hidden * 4 + tb * n_visible * 4
    weight_bytes = n_hidden * vc_dim * 2 + (n_hidden + n_visible) * 4
    vmem_est = 2 * (tile_bytes + weight_bytes) + (4 << 20)   # dbl-buffer + slack
    vmem_limit = int(min(max(vmem_est, 32 << 20), 96 << 20))

    return pl.pallas_call(
        _rbm_kernel,
        out_shape=jax.ShapeDtypeStruct((B, n_visible), jnp.float32),
        grid_spec=pltpu.PrefetchScalarGridSpec(
            num_scalar_prefetch=0,
            grid=grid,
            in_specs=[
                pl.BlockSpec((tb, vc_dim), lambda i: (i, 0)),        # [v|ctx] tile
                pl.BlockSpec((tb, n_hidden), lambda i: (i, 0)),      # uniforms tile
                pl.BlockSpec((n_hidden, vc_dim), lambda i: (0, 0)),  # fused weight
                pl.BlockSpec((1, n_hidden), lambda i: (0, 0)),       # h_bias
                pl.BlockSpec((1, n_visible), lambda i: (0, 0)),      # v_bias
            ],
            out_specs=pl.BlockSpec((tb, n_visible), lambda i: (i, 0)),
        ),
        compiler_params=pltpu.CompilerParams(
            dimension_semantics=("parallel",),
            vmem_limit_bytes=vmem_limit,
        ),
        cost_estimate=cost,
    )(vc, u, wc, hb, vb)


if __name__ == "__main__":
    # Small but TPU-friendly sizes (lane dims are multiples of 128,
    # batch is a multiple of 8).
    batch, n_visible, n_hidden, n_context = 8, 256, 128, 128

    key = jax.random.PRNGKey(0)
    k_w, k_cw, k_v, k_ctx, k_bern = jax.random.split(key, 5)

    # Parameter init matching the torch module:
    #   W:         randn(n_hidden, n_visible) * 0.1
    #   context_W: randn(n_hidden, n_context) * 0.1
    #   h_bias, v_bias: zeros
    W = jax.random.normal(k_w, (n_hidden, n_visible), dtype=jnp.float32) * 0.1
    context_W = jax.random.normal(k_cw, (n_hidden, n_context), dtype=jnp.float32) * 0.1
    h_bias = jnp.zeros((n_hidden,), dtype=jnp.float32)
    v_bias = jnp.zeros((n_visible,), dtype=jnp.float32)

    v = jax.random.uniform(k_v, (batch, n_visible), dtype=jnp.float32)
    context = jax.random.uniform(k_ctx, (batch, n_context), dtype=jnp.float32)

    v_prob = context_aware_rbm_forward(v, context, W, context_W,
                                       h_bias, v_bias, key=k_bern)
    v_prob = jax.block_until_ready(v_prob)

    assert v_prob.shape == (batch, n_visible)
    assert bool(jnp.all(jnp.isfinite(v_prob)))
    assert bool(jnp.all((v_prob >= 0.0) & (v_prob <= 1.0)))
    print("KERNEL_OK")
</pallas_src>

<mosaic_0001>
module attributes {stable_mosaic.version = 11 : i64} {
  func.func @_rbm_kernel(%arg0: i32, %arg1: memref<8x384xbf16, #tpu.memory_space<vmem>>, %arg2: memref<8x128xf32, #tpu.memory_space<vmem>>, %arg3: memref<128x384xbf16, #tpu.memory_space<vmem>>, %arg4: memref<1x128xf32, #tpu.memory_space<vmem>>, %arg5: memref<1x256xf32, #tpu.memory_space<vmem>>, %arg6: memref<8x256xf32, #tpu.memory_space<vmem>>) attributes {dimension_semantics = [#tpu.dimension_semantics<parallel>], iteration_bounds = array<i64: 1>, scalar_prefetch = 0 : i64, scratch_operands = 0 : i64, tpu.core_type = #tpu.core_type<tc>, window_params = [{transform_indices = @transform_0, window_bounds = array<i64: 8, 384>}, {transform_indices = @transform_1, window_bounds = array<i64: 8, 128>}, {pipeline_mode = #tpu.pipeline_mode<synchronous>, transform_indices = @transform_2, window_bounds = array<i64: 128, 384>}, {pipeline_mode = #tpu.pipeline_mode<synchronous>, transform_indices = @transform_3, window_bounds = array<i64: 1, 128>}, {pipeline_mode = #tpu.pipeline_mode<synchronous>, transform_indices = @transform_4, window_bounds = array<i64: 1, 256>}, {transform_indices = @transform_5, window_bounds = array<i64: 8, 256>}]} {
    %c0 = arith.constant 0 : index
    %c0_0 = arith.constant 0 : index
    %0 = vector.load %arg1[%c0, %c0_0] : memref<8x384xbf16, #tpu.memory_space<vmem>>, vector<8x384xbf16>
    %c0_1 = arith.constant 0 : index
    %c0_2 = arith.constant 0 : index
    %1 = vector.load %arg3[%c0_1, %c0_2] : memref<128x384xbf16, #tpu.memory_space<vmem>>, vector<128x384xbf16>
    %cst = arith.constant dense<0.000000e+00> : vector<8x128xf32>
    %2 = tpu.matmul %0, %1, %cst {dimension_numbers = #tpu.dot_dimension_numbers<[1], [1], [0], [0], [0, 0, 1, 0], [], []>} : vector<8x384xbf16>, vector<128x384xbf16>, vector<8x128xf32> -> vector<8x128xf32>
    %c0_3 = arith.constant 0 : index
    %c0_4 = arith.constant 0 : index
    %3 = vector.load %arg4[%c0_3, %c0_4] : memref<1x128xf32, #tpu.memory_space<vmem>>, vector<1x128xf32>
    %4 = vector.broadcast %3 : vector<1x128xf32> to vector<8x128xf32>
    %5 = arith.addf %2, %4 : vector<8x128xf32>
    %6 = arith.negf %5 : vector<8x128xf32>
    %7 = math.exp %6 : vector<8x128xf32>
    %cst_5 = arith.constant 1.000000e+00 : f32
    %8 = vector.broadcast %cst_5 : f32 to vector<8x128xf32>
    %9 = arith.addf %8, %7 : vector<8x128xf32>
    %10 = arith.divf %8, %9 : vector<8x128xf32>
    %c0_6 = arith.constant 0 : index
    %c0_7 = arith.constant 0 : index
    %11 = vector.load %arg2[%c0_6, %c0_7] : memref<8x128xf32, #tpu.memory_space<vmem>>, vector<8x128xf32>
    %12 = arith.cmpf olt, %11, %10 : vector<8x128xf32>
    %13 = arith.extui %12 : vector<8x128xi1> to vector<8x128xi32>
    %14 = arith.sitofp %13 : vector<8x128xi32> to vector<8x128xf32>
    %15 = arith.truncf %14 : vector<8x128xf32> to vector<8x128xbf16>
    %c0_8 = arith.constant 0 : index
    %c0_9 = arith.constant 0 : index
    %16 = vector.load %arg3[%c0_8, %c0_9] : memref<128x384xbf16, #tpu.memory_space<vmem>>, vector<128x256xbf16>
    %cst_10 = arith.constant dense<0.000000e+00> : vector<8x256xf32>
    %17 = tpu.matmul %15, %16, %cst_10 {dimension_numbers = #tpu.dot_dimension_numbers<[1], [0], [0], [1], [0, 0, 1, 1], [], []>} : vector<8x128xbf16>, vector<128x256xbf16>, vector<8x256xf32> -> vector<8x256xf32>
    %c0_11 = arith.constant 0 : index
    %c0_12 = arith.constant 0 : index
    %18 = vector.load %arg5[%c0_11, %c0_12] : memref<1x256xf32, #tpu.memory_space<vmem>>, vector<1x256xf32>
    %19 = vector.broadcast %18 : vector<1x256xf32> to vector<8x256xf32>
    %20 = arith.addf %17, %19 : vector<8x256xf32>
    %21 = arith.negf %20 : vector<8x256xf32>
    %22 = math.exp %21 : vector<8x256xf32>
    %cst_13 = arith.constant 1.000000e+00 : f32
    %23 = vector.broadcast %cst_13 : f32 to vector<8x256xf32>
    %24 = arith.addf %23, %22 : vector<8x256xf32>
    %25 = arith.divf %23, %24 : vector<8x256xf32>
    %c0_14 = arith.constant 0 : index
    %c0_15 = arith.constant 0 : index
    %26 = vector.load %arg6[%c0_14, %c0_15] : memref<8x256xf32, #tpu.memory_space<vmem>>, vector<8x256xf32>
    tpu.vector_store %arg6[%c0_14, %c0_15], %25 {strides = array<i32>} : memref<8x256xf32, #tpu.memory_space<vmem>>, vector<8x256xf32>,
    return
  }
  func.func @transform_0(%arg0: i32) -> (i32, i32) {
    %c0_i32 = arith.constant 0 : i32
    %c0_i32_0 = arith.constant 0 : i32
    return %arg0, %c0_i32 : i32, i32
  }
  func.func @transform_1(%arg0: i32) -> (i32, i32) {
    %c0_i32 = arith.constant 0 : i32
    %c0_i32_0 = arith.constant 0 : i32
    return %arg0, %c0_i32 : i32, i32
  }
  func.func @transform_2(%arg0: i32) -> (i32, i32) {
    %c0_i32 = arith.constant 0 : i32
    %c0_i32_0 = arith.constant 0 : i32
    %c0_i32_1 = arith.constant 0 : i32
    return %c0_i32, %c0_i32_0 : i32, i32
  }
  func.func @transform_3(%arg0: i32) -> (i32, i32) {
    %c0_i32 = arith.constant 0 : i32
    %c0_i32_0 = arith.constant 0 : i32
    %c0_i32_1 = arith.constant 0 : i32
    return %c0_i32, %c0_i32_0 : i32, i32
  }
  func.func @transform_4(%arg0: i32) -> (i32, i32) {
    %c0_i32 = arith.constant 0 : i32
    %c0_i32_0 = arith.constant 0 : i32
    %c0_i32_1 = arith.constant 0 : i32
    return %c0_i32, %c0_i32_0 : i32, i32
  }
  func.func @transform_5(%arg0: i32) -> (i32, i32) {
    %c0_i32 = arith.constant 0 : i32
    %c0_i32_0 = arith.constant 0 : i32
    return %arg0, %c0_i32 : i32, i32
  }
}

</mosaic_0001>

<bundles_post_ra>
// kernel: tpu_custom_call.1
= control target key start
LH: loop header
LB: loop body
LE: loop exit
PB: predicated region body
PF: predicated region fallthrough
CT: control target
= control target key end

     0   :  { %10 = vsyncpa [#allocation3], 0  ;;  %s789_s0 = inlined_call_operand.hbm [shape: bf16[8,384], index: 0, kind: input, shape index: {}]   ;;  %s790_s1 = inlined_call_operand.hbm [shape: f32[8,128], index: 1, kind: input, shape index: {}]   ;;  %s791_s2 = inlined_call_operand.hbm [shape: bf16[128,384], index: 2, kind: input, shape index: {}]   ;;  %s792_s3 = inlined_call_operand.vmem [shape: f32[1,128], index: 3, kind: input, shape index: {}]   ;;  %s793_s4 = inlined_call_operand.vmem [shape: f32[1,256], index: 4, kind: input, shape index: {}]   ;;  %s794_s5 = inlined_call_operand.hbm [shape: f32[8,256], index: 5, kind: output, shape index: {}]  }
   0x1   :  { %11 = vsyncpa [#allocation6], 0 }
   0x2   :  { %12 = vsyncpa [#allocation4], 0  ;;  %s731_s18 = smov [#allocation5]   ;;  %s732_s20 = smov [#allocation2]  }
   0x3   :  { %s29_s19 = sshll.u32 %s731_s18, 4  ;;  %s19_s21 = sshll.u32 %s732_s20, 4  ;;  %s30_s19 = int_to_ptr.vmem [resolvable:$true] %s29_s19  ;;  %s20_s21 = int_to_ptr.vmem [resolvable:$true] %s19_s21 }
   0x4   :  { %s653_s22 = scalar_lea.vmem %s30_s19, 128  ;;  %p658_p1 = scmp.lt.s32.totalorder %s30_s19, %s30_s19 }
   0x5   :  { %p654_p0 = scmp.ne.s32.totalorder %s30_s19, %s653_s22  ;;  %p659_p2 = scmp.lt.s32.totalorder %s653_s22, %s653_s22 }
   0x7   :  { %p660_p3 = por %p659_p2, %p658_p1 }
   0x9   :  { %p661_p4 = pnand %p660_p3, %p654_p0 }
   0xb   :  { %664 = shalt.err (!%p661_p4)
}
   0xc   :  { %32 = dma.hbm_to_vmem [thread:$0]  %s790_s1, 128, %s30_s19, [#allocation6]  }
   0xd   :  { %s673_s25 = scalar_lea.vmem %s20_s21, 192  ;;  %p678_p6 = scmp.lt.s32.totalorder %s20_s21, %s20_s21 }
   0xe   :  { %p674_p5 = scmp.ne.s32.totalorder %s20_s21, %s673_s25  ;;  %p679_p7 = scmp.lt.s32.totalorder %s673_s25, %s673_s25 }
  0x10   :  { %p680_p8 = por %p679_p7, %p678_p6 }
  0x12   :  { %p681_p9 = pnand %p680_p8, %p674_p5 }
  0x14   :  { %684 = shalt.err (!%p681_p9)
}
  0x15   :  { %22 = dma.hbm_to_vmem [thread:$0]  %s789_s0, 192, %s20_s21, [#allocation3]  }
  0x16   :  { %s733_s28 = smov [#allocation7]  }
  0x17   :  { %s38_s29 = sshll.u32 %s733_s28, 4  ;;  %s39_s29 = int_to_ptr.vmem [resolvable:$true] %s38_s29 }
  0x18   :  { %s693_s30 = scalar_lea.vmem %s39_s29, 3072  ;;  %p698_p11 = scmp.lt.s32.totalorder %s39_s29, %s39_s29 }
  0x19   :  { %p694_p10 = scmp.ne.s32.totalorder %s39_s29, %s693_s30  ;;  %p699_p12 = scmp.lt.s32.totalorder %s693_s30, %s693_s30 }
  0x1b   :  { %p700_p13 = por %p699_p12, %p698_p11 }
  0x1d   :  { %p701_p0 = pnand %p700_p13, %p694_p10 }
  0x1f   :  { %704 = shalt.err (!%p701_p0)
}
  0x20   :  { %s734_s1 = smov 192   ;;  %s735_s6 = smov 12  }
  0x21   :  { %44 = dma.hbm_to_vmem [thread:$0]  %s791_s2, 3072, %s39_s29, [#allocation6], %s734_s1, %s734_s1, %s735_s6  }
  0x22   :  { %725 = dma.done.wait [#allocation3], 192  }
  0x23   :  { %726 = vsyncadd [#allocation3], 4294967104 }
  0x24   :  { %727 = dma.done.wait [#allocation6], 3200  }
  0x25   :  { %728 = vsyncadd [#allocation6], 4294964096  ;;  %v736_v0 = vmov 0.0   ;;  %vm737_vm0 = vmmov 0   ;;  %v598_v1 = vld [vmem:[#allocation7 + $0xac] ss:$12 sps:$4 sm:$0xff]   ;;  %v348_v47 = vlaneseq }
  0x26   :  { %568 = vmatprep.subr.bf16.mxu1 %v736_v0  ;;  %584 = vmatprep.mubr.msk.bf16.mxu1 %vm737_vm0, %v736_v0  ;;  %v600_v2 = vld [vmem:[#allocation7 + $0xb0] ss:$12 sps:$4 sm:$0xff]   ;;  %v601_v3 = vld [vmem:[#allocation7 + $0xa8] ss:$12 sps:$4 sm:$0xff]   ;;  %v604_v5 = vld [vmem:[#allocation7 + $0x98] ss:$12 sps:$4 sm:$0xff]  }
  0x27   :  { %239 = vmatprep.subr.bf16.mxu0 %v598_v1  ;;  %569 = vmatpush3.bf16.xpose.msra.mxu1 %v600_v2  ;;  %v602_v4 = vld [vmem:[#allocation7 + $0x94] ss:$12 sps:$4 sm:$0xff]   ;;  %v605_v6 = vld [vmem:[#allocation7 + $0x90] ss:$12 sps:$4 sm:$0xff]   ;;  %v609_v9 = vld [vmem:[#allocation7 + $0x78] ss:$12 sps:$4 sm:$0xff]  }
  0x28   :  { %240 = vmatpush1.bf16.xpose.msra.mxu0 %v601_v3  ;;  %570 = vmatprep.subr.bf16.mxu1 %v736_v0  ;;  %v606_v7 = vld [vmem:[#allocation7 + $0x7c] ss:$12 sps:$4 sm:$0xff]   ;;  %v608_v8 = vld [vmem:[#allocation7 + $0x80] ss:$12 sps:$4 sm:$0xff]   ;;  %v610_v10 = vld [vmem:[#allocation7 + $0x64] ss:$12 sps:$4 sm:$0xff]  }
  0x29   :  { %241 = vmatprep.subr.bf16.mxu0 %v602_v4  ;;  %v59_v11 = vld [vmem:[#allocation2] sm:$0xff]  ;;  %v612_v13 = vld [vmem:[#allocation7 + $0x68] ss:$12 sps:$4 sm:$0xff]   ;;  %v620_v19 = vld [vmem:[#allocation7 + $0x38] ss:$12 sps:$4 sm:$0xff]   ;;  %v738_v29 = vmov 0  }
  0x2a   :  { %v511_v12 = vcombine.high %v59_v11, %v59_v11  ;;  %v613_v14 = vld [vmem:[#allocation7 + $0x60] ss:$12 sps:$4 sm:$0xff]   ;;  %v616_v16 = vld [vmem:[#allocation7 + $0x50] ss:$12 sps:$4 sm:$0xff]   ;;  %v617_v17 = vld [vmem:[#allocation7 + $0x48] ss:$12 sps:$4 sm:$0xff]   ;;  %v510_v28 = vcombine.low %v59_v11, %v59_v11 }
  0x2b   :  { %v614_v15 = vld [vmem:[#allocation7 + $0x4c] ss:$12 sps:$4 sm:$0xff]   ;;  %v618_v18 = vld [vmem:[#allocation7 + $0x34] ss:$12 sps:$4 sm:$0xff]   ;;  %v621_v20 = vld [vmem:[#allocation7 + $0x30] ss:$12 sps:$4 sm:$0xff]  }
  0x2c   :  { %271 = vmatprep.mubr.bf16.mxu0 %v511_v12  ;;  %v622_v21 = vld [vmem:[#allocation7 + $0x1c] ss:$12 sps:$4 sm:$0xff]   ;;  %v624_v22 = vld [vmem:[#allocation7 + $0x20] ss:$12 sps:$4 sm:$0xff]   ;;  %v625_v23 = vld [vmem:[#allocation7 + $0x18] ss:$12 sps:$4 sm:$0xff]  }
  0x2d   :  { %v626_v24 = vld [vmem:[#allocation7 + $0x4] ss:$12 sps:$4 sm:$0xff]   ;;  %v628_v25 = vld [vmem:[#allocation7 + $0x8] ss:$12 sps:$4 sm:$0xff]   ;;  %v629_v26 = vld [vmem:[#allocation7] ss:$12 sps:$4 sm:$0xff]  }
  0x2e   :  { %v632_v27 = vld [vmem:[#allocation2 + $0x8] ss:$0 sps:$4 sm:$0xff]   ;;  %v509_v30 = vld [vmem:[%s792_s3] ss:$0 sm:$0xff]  ;;  %v325_v44 = vld [vmem:[#allocation5] sm:$0xff]  ;;  %v349_v48 = vshrl.u32 %v348_v47, 7 }
  0x2f   :  { %571 = vmatpush3.bf16.xpose.msra.mxu1 %v604_v5  ;;  %v739_v46 = vmov 1.0|1.0   ;;  %v346_v50 = vld [vmem:[%s793_s4] sm:$0x3]  ;;  %s740_s4 = smov [#allocation8]  }
  0x30   :  { %242 = vmatpush1.bf16.xpose.msra.mxu0 %v605_v6  ;;  %572 = vmatprep.subr.bf16.mxu1 %v736_v0  ;;  %v350_v49 = vsub.s32 0, %v349_v48  ;;  %v354_v51 = vsub.s32 1, %v349_v48  ;;  %s499_s10 = sshll.u32 %s740_s4, 4  ;;  %s500_s10 = int_to_ptr.vmem [resolvable:$true] %s499_s10 }
  0x31   :  { %243 = vmatprep.subr.bf16.mxu0 %v606_v7  ;;  %s705_s11 = scalar_lea.vmem %s500_s10, 256  ;;  %p710_p2 = scmp.lt.s32.totalorder %s500_s10, %s500_s10 }
  0x32   :  { %v351_v52 = vrot.slane %v346_v50, %v350_v49  ;;  %v355_v53 = vrot.slane %v346_v50, %v354_v51  ;;  %p706_p1 = scmp.ne.s32.totalorder %s500_s10, %s705_s11  ;;  %p711_p3 = scmp.lt.s32.totalorder %s705_s11, %s705_s11 }
  0x34   :  { %p712_p4 = por %p711_p3, %p710_p2 }
  0x36   :  { %p713_p5 = pnand %p712_p4, %p706_p1 }
  0x37   :  { %573 = vmatpush3.bf16.xpose.msra.mxu1 %v608_v8 }
  0x38   :  { %244 = vmatpush1.bf16.xpose.msra.mxu0 %v609_v9  ;;  %574 = vmatprep.subr.bf16.mxu1 %v736_v0 }
  0x39   :  { %245 = vmatprep.subr.bf16.mxu0 %v610_v10 }
  0x3f   :  { %575 = vmatpush3.bf16.xpose.msra.mxu1 %v612_v13 }
  0x40   :  { %246 = vmatpush1.bf16.xpose.msra.mxu0 %v613_v14  ;;  %576 = vmatprep.subr.bf16.mxu1 %v736_v0 }
  0x41   :  { %247 = vmatprep.subr.bf16.mxu0 %v614_v15 }
  0x47   :  { %577 = vmatpush3.bf16.xpose.msra.mxu1 %v616_v16 }
  0x48   :  { %248 = vmatpush1.bf16.xpose.msra.mxu0 %v617_v17  ;;  %578 = vmatprep.subr.bf16.mxu1 %v736_v0 }
  0x49   :  { %249 = vmatprep.subr.bf16.mxu0 %v618_v18 }
  0x4f   :  { %579 = vmatpush3.bf16.xpose.msra.mxu1 %v620_v19 }
  0x50   :  { %250 = vmatpush1.bf16.xpose.msra.mxu0 %v621_v20  ;;  %580 = vmatprep.subr.bf16.mxu1 %v736_v0 }
  0x51   :  { %251 = vmatprep.subr.bf16.mxu0 %v622_v21 }
  0x57   :  { %581 = vmatpush3.bf16.xpose.msra.mxu1 %v624_v22 }
  0x58   :  { %252 = vmatpush1.bf16.xpose.msra.mxu0 %v625_v23  ;;  %582 = vmatprep.subr.bf16.mxu1 %v736_v0 }
  0x59   :  { %253 = vmatprep.subr.bf16.mxu0 %v626_v24 }
  0x5f   :  { %583 = vmatpush3.bf16.xpose.msra.mxu1 %v628_v25 }
  0x60   :  { %254 = vmatpush1.bf16.xpose.msra.mxu0 %v629_v26 }
  0x61   :  { %438 = vmatprep.subr.bf16.mxu0 %v598_v1 }
  0x66   :  { %585 = vmatmul.mubr.bf16.vlgmr.msra.gmra.mxu1 %v632_v27 }
  0x67   :  { %272 = vmatmul.mubr.bf16.vlgmr.msra.gmra.mxu0 %v510_v28 }
  0x68   :  { %439 = vmatpush1.bf16.msra.mxu0 %v601_v3  ;;  %470 = vmatprep.mubr.bf16.mxu0 %v738_v29 }
  0x69   :  { %440 = vmatprep.subr.bf16.mxu0 %v602_v4 }
  0x6c   :  { %441 = vmatpush1.bf16.msra.mxu0 %v605_v6 }
  0x6d   :  { %442 = vmatprep.subr.bf16.mxu0 %v606_v7 }
  0x70   :  { %443 = vmatpush1.bf16.msra.mxu0 %v609_v9 }
  0x71   :  { %444 = vmatprep.subr.bf16.mxu0 %v610_v10 }
  0x74   :  { %445 = vmatpush1.bf16.msra.mxu0 %v613_v14 }
  0x75   :  { %446 = vmatprep.subr.bf16.mxu0 %v614_v15 }
  0x78   :  { %447 = vmatpush1.bf16.msra.mxu0 %v617_v17 }
  0x79   :  { %448 = vmatprep.subr.bf16.mxu0 %v618_v18 }
  0x7c   :  { %449 = vmatpush1.bf16.msra.mxu0 %v621_v20 }
  0x7d   :  { %450 = vmatprep.subr.bf16.mxu0 %v622_v21 }
  0x80   :  { %451 = vmatpush1.bf16.msra.mxu0 %v625_v23 }
  0x81   :  { %452 = vmatprep.subr.bf16.mxu0 %v626_v24 }
  0x84   :  { %453 = vmatpush1.bf16.msra.mxu0 %v629_v26 }
 0x126   :  { %v313_v31 = vpop.f32.mrf.mxu1 }
 0x127   :  { %v273_v32 = vpop.f32.mrf.mxu0 }
 0x128   :  { %v274_v33 = vadd.f32 %v509_v30, %v273_v32  ;;  %v586_v34 = vpop.f32.mrf.mxu1 }
 0x129   :  { %v275_v35 = vpop.f32.mrf.mxu0 }
 0x12a   :  { %v314_v36 = vadd.f32 %v313_v31, %v274_v33  ;;  %v316_v37 = vpop.f32.mrf.mxu1 }
 0x12b   :  { %v276_v38 = vpop.f32.mrf.mxu0 }
 0x12c   :  { %v537_v39 = vmul.f32 -1.442695, %v314_v36  ;;  %v587_v40 = vpop.f32.mrf.mxu1 }
 0x12d   :  { %v277_v41 = vpop.f32.mrf.mxu0 }
 0x12e   :  { %633 = vpow2.f32 %v537_v39 }
 0x13b   :  { %v634_v42 = vpop.eup %633 }
 0x13c   :  { %v322_v43 = vadd.f32 1.0, %v634_v42 }
 0x13e   :  { %635 = vrcp.f32 %v322_v43 }
 0x14b   :  { %v636_v45 = vpop.eup %635 }
 0x14c   :  { %vm326_vm1 = vcmp.lt.f32.partialorder %v325_v44, %v636_v45 }
 0x14d   :  { %vm555_vm2 = vmpackc.low %vm326_vm1, %vm326_vm1 }
 0x14e   :  { %556 = vmatmul.mubr.msk.bf16.vlgmr.msra.gmra.mxu0 %vm555_vm2, %v739_v46 }
 0x20e   :  { %v472_v54 = vpop.f32.mrf.mxu0 }
 0x20f   :  { %v473_v55 = vadd.f32 %v472_v54, %v351_v52 }
 0x210   :  { %v474_v56 = vpop.f32.mrf.mxu0 }
 0x211   :  { %v557_v57 = vmul.f32 -1.442695, %v473_v55  ;;  %v475_v58 = vadd.f32 %v474_v56, %v355_v53 }
 0x212   :  { %v476_v59 = vpop.f32.mrf.mxu0 }
 0x213   :  { %637 = vpow2.f32 %v557_v57  ;;  %v558_v60 = vmul.f32 -1.442695, %v475_v58 }
 0x214   :  { %v477_v61 = vpop.f32.mrf.mxu0 }
 0x215   :  { %639 = vpow2.f32 %v558_v60 }
 0x220   :  { %v638_v62 = vpop.eup %637 }
 0x221   :  { %v485_v63 = vadd.f32 1.0, %v638_v62 }
 0x222   :  { %v640_v0 = vpop.eup %639 }
 0x223   :  { %641 = vrcp.f32 %v485_v63  ;;  %v486_v1 = vadd.f32 1.0, %v640_v0 }
 0x225   :  { %643 = vrcp.f32 %v486_v1 }
 0x230   :  { %v642_v2 = vpop.eup %641 }
 0x231   :  { %491 = vst [vmem:[#allocation8] sm:$0xff] %v642_v2 }
 0x232   :  { %v644_v3 = vpop.eup %643 }
 0x233   :  { %492 = vst [vmem:[#allocation8 + $0x8] sm:$0xff] %v644_v3 }
 0x234   :  { %716 = shalt.err (!%p713_p5)
}
 0x235   :  { %502 = dma.vmem_to_hbm [thread:$0]  %s500_s10, 256, %s794_s5, [#allocation4]  }
 0x236   :  { %729 = dma.done.wait [#allocation4], 256  }
 0x237   :  { %730 = vsyncadd [#allocation4], 4294967040 }
 0x238   :  { %506 = vsyncpa [#allocation3], 1 }
 0x239   :  { %507 = vsyncpa [#allocation6], 1 }
 0x23a   :  { %508 = vsyncpa [#allocation4], 1 }

</bundles_post_ra>
